<compile_context>
chip_gen: v6e
topology: v6e:2x2x1
jax: 0.10.0
libtpu: 0.0.40
codegen_flags: <defaults>
</compile_context>

<pallas_src>
import functools

import jax
import jax.numpy as jnp
from jax.experimental import pallas as pl
from jax.experimental.pallas import tpu as pltpu

_LANE = 128


def _round_up(x, m):
    return ((x + m - 1) // m) * m


def _vmem_limit_bytes():
    """Generation-aware VMEM budget: ~3/4 of physical, capped at 100 MiB."""
    try:
        cap = int(pltpu.get_tpu_info().vmem_capacity_bytes)
    except Exception:  # pragma: no cover - non-TPU backend / older jax
        cap = 64 * 1024 * 1024
    return max(32 * 1024 * 1024, min(cap * 3 // 4, 100 * 1024 * 1024))


# ----------------------------- Fused Pallas kernel ---------------------------


def _fused_gcn_pool_kernel(adj_idx_ref, a_ref, x_ref, w1_ref, b1_ref, w2_ref,
                           b2_ref, p_ref, z_ref, g_ref, *, contract_adj_first):
    """Per-view fused 2-layer GCN + mean-pool readout.

        h = relu(A @ (X @ W1) + b1)        (or (A @ X) @ W1 when hp is wide)
        z =       A @ (h @ W2) + b2
        g = P @ z

    A / X / W / h / P are bf16 MXU operands; accumulation and all element-wise
    work (bias add, relu) stay in f32.
    """
    del adj_idx_ref                      # consumed only by the index_maps
    a = a_ref[...]                       # [N, N]   bf16
    x = x_ref[...]                       # [N, F]   bf16

    # ----- layer 1 -----------------------------------------------------------
    if contract_adj_first:
        # Contract A against the narrow feature dim first when hp needs
        # multiple 256-wide MXU output passes.
        ax = jnp.dot(a, x, preferred_element_type=jnp.float32)
        h = jnp.dot(ax.astype(jnp.bfloat16), w1_ref[...],
                    preferred_element_type=jnp.float32)
    else:
        xw = jnp.dot(x, w1_ref[...], preferred_element_type=jnp.float32)
        h = jnp.dot(a, xw.astype(jnp.bfloat16),
                    preferred_element_type=jnp.float32)
    h = jnp.maximum(h + b1_ref[...], 0.0)          # f32 bias + relu

    # ----- layer 2 -----------------------------------------------------------
    hw = jnp.dot(h.astype(jnp.bfloat16), w2_ref[...],
                 preferred_element_type=jnp.float32)
    z = jnp.dot(a, hw.astype(jnp.bfloat16),
                preferred_element_type=jnp.float32)
    z = z + b2_ref[...]

    # ----- fused mean-pool readout (bf16 MXU feed, f32 accumulate) -----------
    pooled = jnp.dot(p_ref[...], z.astype(jnp.bfloat16),
                     preferred_element_type=jnp.float32)

    z_ref[...] = z.astype(z_ref.dtype)             # bf16 lane-dense store
    g_ref[...] = pooled.astype(g_ref.dtype)


def prepare_params(params):
    """One-time: pad hidden dim to a lane multiple, cast MXU operands to bf16."""
    h = params["w1"].shape[1]
    hp = _round_up(max(h, _LANE), _LANE)
    return {
        "hidden": h,
        "hidden_pad": hp,
        "w1": jnp.pad(params["w1"], ((0, 0), (0, hp - h))).astype(jnp.bfloat16),
        "b1": jnp.pad(params["b1"], ((0, 0), (0, hp - h))).astype(jnp.float32),
        "w2": jnp.pad(params["w2"], ((0, hp - h), (0, hp - h))).astype(jnp.bfloat16),
        "b2": jnp.pad(params["b2"], ((0, 0), (0, hp - h))).astype(jnp.float32),
    }


def fused_gcn_pool(a_stack, adj_idx, x_stack, p, prepared):
    """Run all augmentation views in one pallas_call (grid axis = view).

    a_stack holds only the *unique* normalized adjacencies; adj_idx[view]
    selects the slot via scalar prefetch.
    """
    n_adj, n, _ = a_stack.shape
    v, _, f = x_stack.shape
    h = prepared["hidden"]
    hp = prepared["hidden_pad"]
    ng = p.shape[0]
    w1, b1, w2, b2 = (prepared["w1"], prepared["b1"],
                      prepared["w2"], prepared["b2"])

    # Reassociate layer 1 only once hp exceeds a single MXU output pass.
    contract_adj_first = (hp > 256) and (f < hp)

    flops = v * (2 * n * f * hp + 4 * n * n * hp + 2 * n * hp * hp
                 + 2 * ng * n * hp)
    bytes_accessed = (n_adj * n * n * 2 + v * n * f * 2
                      + 2 * (f * hp + hp * hp) + 8 * hp + ng * n * 2
                      + v * (n * hp + ng * hp) * 2)
    cost = pl.CostEstimate(flops=flops, transcendentals=0,
                           bytes_accessed=bytes_accessed)

    def _const_spec(shape, single_buffer):
        """Resident operand: constant index_map across the view axis."""
        zeros = (0,) * len(shape)
        index_map = lambda i, adj: zeros
        if single_buffer:
            return pl.BlockSpec(shape, index_map, pipeline_mode=pl.Buffered(1))
        return pl.BlockSpec(shape, index_map)

    def _call(single_buffer_weights):
        grid_spec = pltpu.PrefetchScalarGridSpec(
            num_scalar_prefetch=1,
            grid=(v,),
            in_specs=[
                # A_hat: slot chosen by the prefetched adjacency index.
                pl.BlockSpec((None, n, n), lambda i, adj: (adj[i], 0, 0)),
                pl.BlockSpec((None, n, f), lambda i, adj: (i, 0, 0)),    # X
                _const_spec((f, hp), single_buffer_weights),             # W1
                _const_spec((1, hp), single_buffer_weights),             # b1
                _const_spec((hp, hp), single_buffer_weights),            # W2
                _const_spec((1, hp), single_buffer_weights),             # b2
                _const_spec((ng, n), single_buffer_weights),             # P
            ],
            out_specs=(
                pl.BlockSpec((None, n, hp), lambda i, adj: (i, 0, 0)),
                pl.BlockSpec((None, ng, hp), lambda i, adj: (i, 0, 0)),
            ),
        )
        return pl.pallas_call(
            functools.partial(_fused_gcn_pool_kernel,
                              contract_adj_first=contract_adj_first),
            out_shape=(
                jax.ShapeDtypeStruct((v, n, hp), jnp.bfloat16),
                jax.ShapeDtypeStruct((v, ng, hp), jnp.bfloat16),
            ),
            grid_spec=grid_spec,
            compiler_params=pltpu.CompilerParams(
                dimension_semantics=("parallel",),
                vmem_limit_bytes=_vmem_limit_bytes()),
            cost_estimate=cost,
        )(adj_idx, a_stack, x_stack, w1, b1, w2, b2, p)

    try:
        z_pad, g_pad = _call(True)
    except Exception:  # pragma: no cover
        # TODO(synk): pipeline_mode=pl.Buffered(1) unsupported on this jax
        # build; fall back to default double-buffering of resident weights.
        z_pad, g_pad = _call(False)

    # Strip the lane padding of the hidden dim (bf16 -> half the copy bytes).
    return z_pad[..., :h], g_pad[..., :h]


# --------------------------------- JAX glue ----------------------------------


def build_norm_adj(edge_index, edge_attr, num_nodes):
    """Dense GCN-normalized adjacency  D^-1/2 (A + I) D^-1/2 (bf16 MXU feed)."""
    src = edge_index[0]
    dst = edge_index[1]
    adj = jnp.zeros((num_nodes, num_nodes), jnp.float32)
    adj = adj.at[dst, src].add(edge_attr.astype(jnp.float32))
    adj = adj + jnp.eye(num_nodes, dtype=jnp.float32)
    deg = adj.sum(axis=1)
    d_inv_sqrt = jax.lax.rsqrt(jnp.maximum(deg, 1e-12))
    return (adj * d_inv_sqrt[:, None] * d_inv_sqrt[None, :]).astype(jnp.bfloat16)


def pooling_matrix(batch, num_graphs, num_nodes):
    """P[g, n] = 1/count_g if batch[n] == g else 0 (mean readout), bf16."""
    del num_nodes
    one_hot = (batch[None, :] == jnp.arange(num_graphs)[:, None]).astype(
        jnp.float32)                                   # [G, N]
    counts = jnp.maximum(one_hot.sum(axis=1, keepdims=True), 1.0)
    return (one_hot / counts).astype(jnp.bfloat16)


def gcn_encoder_views(prepared, *, views, lengths, batch, num_graphs):
    """Batched multi-view GCN encoder: one fused Pallas call for all views.

    `views` is a list of (x, edge_index, edge_attr, prompt) tuples.
    Returns a list of (z, g) per view.
    """
    # TODO(synk): `lengths` is unused by this GCN encoder (kept for API parity).
    del lengths
    n = views[0][0].shape[0]

    # Deduplicate adjacency builds & DMAs: views sharing (edge_index, edge_attr)
    # objects map to one A_hat slot (feature masking does not touch edges).
    # TODO(synk): id()-keyed dedup misses value-equal copies; a structural
    # "edges changed" flag from the augmentor would be more robust.
    adj_slot = {}
    a_list, x_list, adj_idx = [], [], []
    for (x, edge_index, edge_attr, prompt) in views:
        if prompt is not None:
            x = x + prompt                        # prompt [1, F] broadcast
        key = (id(edge_index), id(edge_attr))
        if key not in adj_slot:
            adj_slot[key] = len(a_list)
            a_list.append(build_norm_adj(edge_index, edge_attr, n))
        adj_idx.append(adj_slot[key])
        x_list.append(x.astype(jnp.bfloat16))

    a_stack = jnp.stack(a_list)                        # [n_adj, N, N] bf16
    x_stack = jnp.stack(x_list)                        # [V, N, F]     bf16
    adj_idx = jnp.asarray(adj_idx, dtype=jnp.int32)    # [V] scalar prefetch
    p = pooling_matrix(batch, num_graphs, n)           # [G, N] bf16

    z_all, g_all = fused_gcn_pool(a_stack, adj_idx, x_stack, p, prepared)
    return [(z_all[i], g_all[i]) for i in range(len(views))]


# ------------------------------- Augmentations -------------------------------


def feature_masking_aug(key, drop_prob=0.25):
    def aug(x, edge_index, edge_attr):
        keep = (jax.random.uniform(key, (1, x.shape[1])) >= drop_prob)
        # Returns the original edge arrays -> adjacency is deduped downstream.
        return x * keep.astype(x.dtype), edge_index, edge_attr
    return aug


def edge_dropping_aug(key, drop_prob=0.25):
    def aug(x, edge_index, edge_attr):
        keep = (jax.random.uniform(key, edge_attr.shape) >= drop_prob)
        return x, edge_index, edge_attr * keep.astype(edge_attr.dtype)
    return aug


# ------------------------------ Encoder wrapper ------------------------------


class Encoder:
    """Mirror of the PyTorch Encoder(encoder, augmentor) forward.

    The three encoder evaluations (original / aug1 / aug2) are batched into a
    single fused Pallas call to amortize launch overhead and share weights.
    """

    def __init__(self, encoder, augmentor):
        self.encoder = encoder
        self.augmentor = augmentor

    def forward(self, x, edge_index, edge_attr, lengths, batch, prompt=None):
        aug1, aug2 = self.augmentor
        x1, edge_index1, edge_weight1 = aug1(x, edge_index, edge_attr)
        x2, edge_index2, edge_weight2 = aug2(x, edge_index, edge_attr)
        (z, g), (z1, g1), (z2, g2) = self.encoder(
            views=[
                (x, edge_index, edge_attr, prompt),
                (x1, edge_index1, edge_weight1, None),
                (x2, edge_index2, edge_weight2, None),
            ],
            lengths=lengths, batch=batch)
        return (z, g, z1, z2, g1, g2)


# ----------------------------------- Main ------------------------------------


if __name__ == "__main__":
    key = jax.random.PRNGKey(0)
    (k_x, k_src, k_dst, k_ea, k_w1, k_w2, k_prompt,
     k_aug1, k_aug2) = jax.random.split(key, 9)

    N, F, H, G, E = 16, 8, 32, 2, 48   # nodes, feat, hidden, graphs, edges

    # Deterministic synthetic graph batch (2 graphs of 8 nodes each).
    x = jax.random.normal(k_x, (N, F), dtype=jnp.float32)
    src = jax.random.randint(k_src, (E,), 0, N)
    dst = jax.random.randint(k_dst, (E,), 0, N)
    edge_index = jnp.stack([src, dst], axis=0)          # [2, E]
    edge_attr = jax.random.uniform(k_ea, (E,), dtype=jnp.float32) + 0.5
    batch = jnp.repeat(jnp.arange(G), N // G)           # [N] graph ids
    lengths = jnp.full((G,), N // G, dtype=jnp.int32)
    prompt = 0.01 * jax.random.normal(k_prompt, (1, F), dtype=jnp.float32)

    # Deterministic encoder parameters (shapes implied by the 2-layer GCN).
    params = {
        "w1": 0.1 * jax.random.normal(k_w1, (F, H), dtype=jnp.float32),
        "b1": jnp.zeros((1, H), jnp.float32),
        "w2": 0.1 * jax.random.normal(k_w2, (H, H), dtype=jnp.float32),
        "b2": jnp.zeros((1, H), jnp.float32),
    }
    prepared = prepare_params(params)    # pad + bf16-cast once (hoisted)

    encoder_fn = functools.partial(gcn_encoder_views, prepared, num_graphs=G)
    augmentor = (feature_masking_aug(k_aug1), edge_dropping_aug(k_aug2))
    model = Encoder(encoder_fn, augmentor)

    outs = model.forward(x, edge_index, edge_attr, lengths, batch, prompt)
    outs = jax.block_until_ready(outs)

    z, g, z1, z2, g1, g2 = outs
    assert z.shape == (N, H) and z1.shape == (N, H) and z2.shape == (N, H)
    assert g.shape == (G, H) and g1.shape == (G, H) and g2.shape == (G, H)
    assert all(bool(jnp.all(jnp.isfinite(o.astype(jnp.float32)))) for o in outs)
    print("KERNEL_OK")
</pallas_src>

<mosaic_0001>
module attributes {stable_mosaic.version = 11 : i64} {
  func.func @_fused_gcn_pool_kernel(%arg0: i32, %arg1: memref<3xi32, #tpu.memory_space<smem>>, %arg2: memref<1x16x16xbf16, #tpu.memory_space<vmem>>, %arg3: memref<1x16x8xbf16, #tpu.memory_space<vmem>>, %arg4: memref<8x128xbf16, #tpu.memory_space<vmem>>, %arg5: memref<1x128xf32, #tpu.memory_space<vmem>>, %arg6: memref<128x128xbf16, #tpu.memory_space<vmem>>, %arg7: memref<1x128xf32, #tpu.memory_space<vmem>>, %arg8: memref<2x16xbf16, #tpu.memory_space<vmem>>, %arg9: memref<1x16x128xbf16, #tpu.memory_space<vmem>>, %arg10: memref<1x2x128xbf16, #tpu.memory_space<vmem>>) attributes {dimension_semantics = [#tpu.dimension_semantics<parallel>], iteration_bounds = array<i64: 3>, scalar_prefetch = 1 : i64, scratch_operands = 0 : i64, tpu.core_type = #tpu.core_type<tc>, window_params = [{transform_indices = @transform_0, window_bounds = array<i64: 1, 16, 16>}, {transform_indices = @transform_1, window_bounds = array<i64: 1, 16, 8>}, {pipeline_mode = #tpu.pipeline_mode<synchronous>, transform_indices = @transform_2, window_bounds = array<i64: 8, 128>}, {pipeline_mode = #tpu.pipeline_mode<synchronous>, transform_indices = @transform_3, window_bounds = array<i64: 1, 128>}, {pipeline_mode = #tpu.pipeline_mode<synchronous>, transform_indices = @transform_4, window_bounds = array<i64: 128, 128>}, {pipeline_mode = #tpu.pipeline_mode<synchronous>, transform_indices = @transform_5, window_bounds = array<i64: 1, 128>}, {pipeline_mode = #tpu.pipeline_mode<synchronous>, transform_indices = @transform_6, window_bounds = array<i64: 2, 16>}, {transform_indices = @transform_7, window_bounds = array<i64: 1, 16, 128>}, {transform_indices = @transform_8, window_bounds = array<i64: 1, 2, 128>}]} {
    %c0 = arith.constant 0 : index
    %c0_0 = arith.constant 0 : index
    %c0_1 = arith.constant 0 : index
    %0 = vector.load %arg2[%c0, %c0_0, %c0_1] : memref<1x16x16xbf16, #tpu.memory_space<vmem>>, vector<1x16x16xbf16>
    %1 = vector.shape_cast %0 : vector<1x16x16xbf16> to vector<16x16xbf16>
    %c0_2 = arith.constant 0 : index
    %c0_3 = arith.constant 0 : index
    %c0_4 = arith.constant 0 : index
    %2 = vector.load %arg3[%c0_2, %c0_3, %c0_4] : memref<1x16x8xbf16, #tpu.memory_space<vmem>>, vector<1x16x8xbf16>
    %3 = vector.shape_cast %2 : vector<1x16x8xbf16> to vector<16x8xbf16>
    %c0_5 = arith.constant 0 : index
    %c0_6 = arith.constant 0 : index
    %4 = vector.load %arg4[%c0_5, %c0_6] : memref<8x128xbf16, #tpu.memory_space<vmem>>, vector<8x128xbf16>
    %cst = arith.constant dense<0.000000e+00> : vector<16x128xf32>
    %5 = tpu.matmul %3, %4, %cst {dimension_numbers = #tpu.dot_dimension_numbers<[1], [0], [0], [1], [0, 0, 1, 1], [], []>} : vector<16x8xbf16>, vector<8x128xbf16>, vector<16x128xf32> -> vector<16x128xf32>
    %6 = arith.truncf %5 : vector<16x128xf32> to vector<16x128xbf16>
    %cst_7 = arith.constant dense<0.000000e+00> : vector<16x128xf32>
    %7 = tpu.matmul %1, %6, %cst_7 {dimension_numbers = #tpu.dot_dimension_numbers<[1], [0], [0], [1], [0, 0, 1, 1], [], []>} : vector<16x16xbf16>, vector<16x128xbf16>, vector<16x128xf32> -> vector<16x128xf32>
    %c0_8 = arith.constant 0 : index
    %c0_9 = arith.constant 0 : index
    %8 = vector.load %arg5[%c0_8, %c0_9] : memref<1x128xf32, #tpu.memory_space<vmem>>, vector<1x128xf32>
    %9 = vector.broadcast %8 : vector<1x128xf32> to vector<16x128xf32>
    %10 = arith.addf %7, %9 : vector<16x128xf32>
    %cst_10 = arith.constant 0.000000e+00 : f32
    %11 = vector.broadcast %cst_10 : f32 to vector<16x128xf32>
    %12 = arith.maximumf %10, %11 : vector<16x128xf32>
    %13 = arith.truncf %12 : vector<16x128xf32> to vector<16x128xbf16>
    %c0_11 = arith.constant 0 : index
    %c0_12 = arith.constant 0 : index
    %14 = vector.load %arg6[%c0_11, %c0_12] : memref<128x128xbf16, #tpu.memory_space<vmem>>, vector<128x128xbf16>
    %cst_13 = arith.constant dense<0.000000e+00> : vector<16x128xf32>
    %15 = tpu.matmul %13, %14, %cst_13 {dimension_numbers = #tpu.dot_dimension_numbers<[1], [0], [0], [1], [0, 0, 1, 1], [], []>} : vector<16x128xbf16>, vector<128x128xbf16>, vector<16x128xf32> -> vector<16x128xf32>
    %16 = arith.truncf %15 : vector<16x128xf32> to vector<16x128xbf16>
    %cst_14 = arith.constant dense<0.000000e+00> : vector<16x128xf32>
    %17 = tpu.matmul %1, %16, %cst_14 {dimension_numbers = #tpu.dot_dimension_numbers<[1], [0], [0], [1], [0, 0, 1, 1], [], []>} : vector<16x16xbf16>, vector<16x128xbf16>, vector<16x128xf32> -> vector<16x128xf32>
    %c0_15 = arith.constant 0 : index
    %c0_16 = arith.constant 0 : index
    %18 = vector.load %arg7[%c0_15, %c0_16] : memref<1x128xf32, #tpu.memory_space<vmem>>, vector<1x128xf32>
    %19 = vector.broadcast %18 : vector<1x128xf32> to vector<16x128xf32>
    %20 = arith.addf %17, %19 : vector<16x128xf32>
    %c0_17 = arith.constant 0 : index
    %c0_18 = arith.constant 0 : index
    %21 = vector.load %arg8[%c0_17, %c0_18] : memref<2x16xbf16, #tpu.memory_space<vmem>>, vector<2x16xbf16>
    %22 = arith.truncf %20 : vector<16x128xf32> to vector<16x128xbf16>
    %cst_19 = arith.constant dense<0.000000e+00> : vector<2x128xf32>
    %23 = tpu.matmul %21, %22, %cst_19 {dimension_numbers = #tpu.dot_dimension_numbers<[1], [0], [0], [1], [0, 0, 1, 1], [], []>} : vector<2x16xbf16>, vector<16x128xbf16>, vector<2x128xf32> -> vector<2x128xf32>
    %24 = arith.truncf %20 : vector<16x128xf32> to vector<16x128xbf16>
    %c0_20 = arith.constant 0 : index
    %c0_21 = arith.constant 0 : index
    %c0_22 = arith.constant 0 : index
    %25 = vector.load %arg9[%c0_20, %c0_21, %c0_22] : memref<1x16x128xbf16, #tpu.memory_space<vmem>>, vector<1x16x128xbf16>
    %26 = vector.shape_cast %25 : vector<1x16x128xbf16> to vector<16x128xbf16>
    %27 = vector.shape_cast %24 : vector<16x128xbf16> to vector<1x16x128xbf16>
    tpu.vector_store %arg9[%c0_20, %c0_21, %c0_22], %27 {strides = array<i32>} : memref<1x16x128xbf16, #tpu.memory_space<vmem>>, vector<1x16x128xbf16>,
    %28 = arith.truncf %23 : vector<2x128xf32> to vector<2x128xbf16>
    %c0_23 = arith.constant 0 : index
    %c0_24 = arith.constant 0 : index
    %c0_25 = arith.constant 0 : index
    %29 = vector.load %arg10[%c0_23, %c0_24, %c0_25] : memref<1x2x128xbf16, #tpu.memory_space<vmem>>, vector<1x2x128xbf16>
    %30 = vector.shape_cast %29 : vector<1x2x128xbf16> to vector<2x128xbf16>
    %31 = vector.shape_cast %28 : vector<2x128xbf16> to vector<1x2x128xbf16>
    tpu.vector_store %arg10[%c0_23, %c0_24, %c0_25], %31 {strides = array<i32>} : memref<1x2x128xbf16, #tpu.memory_space<vmem>>, vector<1x2x128xbf16>,
    return
  }
  func.func @transform_0(%arg0: i32, %arg1: memref<3xi32, #tpu.memory_space<smem>>) -> (i32, i32, i32) {
    %0 = arith.index_cast %arg0 : i32 to index
    %1 = memref.load %arg1[%0] : memref<3xi32, #tpu.memory_space<smem>>
    %c0_i32 = arith.constant 0 : i32
    %c0_i32_0 = arith.constant 0 : i32
    %c0_i32_1 = arith.constant 0 : i32
    return %1, %c0_i32, %c0_i32_0 : i32, i32, i32
  }
  func.func @transform_1(%arg0: i32, %arg1: memref<3xi32, #tpu.memory_space<smem>>) -> (i32, i32, i32) {
    %c0_i32 = arith.constant 0 : i32
    %c0_i32_0 = arith.constant 0 : i32
    %c0_i32_1 = arith.constant 0 : i32
    return %arg0, %c0_i32, %c0_i32_0 : i32, i32, i32
  }
  func.func @transform_2(%arg0: i32, %arg1: memref<3xi32, #tpu.memory_space<smem>>) -> (i32, i32) {
    %c0_i32 = arith.constant 0 : i32
    %c0_i32_0 = arith.constant 0 : i32
    %c0_i32_1 = arith.constant 0 : i32
    return %c0_i32, %c0_i32_0 : i32, i32
  }
  func.func @transform_3(%arg0: i32, %arg1: memref<3xi32, #tpu.memory_space<smem>>) -> (i32, i32) {
    %c0_i32 = arith.constant 0 : i32
    %c0_i32_0 = arith.constant 0 : i32
    %c0_i32_1 = arith.constant 0 : i32
    return %c0_i32, %c0_i32_0 : i32, i32
  }
  func.func @transform_4(%arg0: i32, %arg1: memref<3xi32, #tpu.memory_space<smem>>) -> (i32, i32) {
    %c0_i32 = arith.constant 0 : i32
    %c0_i32_0 = arith.constant 0 : i32
    %c0_i32_1 = arith.constant 0 : i32
    return %c0_i32, %c0_i32_0 : i32, i32
  }
  func.func @transform_5(%arg0: i32, %arg1: memref<3xi32, #tpu.memory_space<smem>>) -> (i32, i32) {
    %c0_i32 = arith.constant 0 : i32
    %c0_i32_0 = arith.constant 0 : i32
    %c0_i32_1 = arith.constant 0 : i32
    return %c0_i32, %c0_i32_0 : i32, i32
  }
  func.func @transform_6(%arg0: i32, %arg1: memref<3xi32, #tpu.memory_space<smem>>) -> (i32, i32) {
    %c0_i32 = arith.constant 0 : i32
    %c0_i32_0 = arith.constant 0 : i32
    %c0_i32_1 = arith.constant 0 : i32
    return %c0_i32, %c0_i32_0 : i32, i32
  }
  func.func @transform_7(%arg0: i32, %arg1: memref<3xi32, #tpu.memory_space<smem>>) -> (i32, i32, i32) {
    %c0_i32 = arith.constant 0 : i32
    %c0_i32_0 = arith.constant 0 : i32
    %c0_i32_1 = arith.constant 0 : i32
    return %arg0, %c0_i32, %c0_i32_0 : i32, i32, i32
  }
  func.func @transform_8(%arg0: i32, %arg1: memref<3xi32, #tpu.memory_space<smem>>) -> (i32, i32, i32) {
    %c0_i32 = arith.constant 0 : i32
    %c0_i32_0 = arith.constant 0 : i32
    %c0_i32_1 = arith.constant 0 : i32
    return %arg0, %c0_i32, %c0_i32_0 : i32, i32, i32
  }
}

module attributes {stable_mosaic.version = 11 : i64} {
  func.func @_fused_gcn_pool_kernel(%arg0: i32, %arg1: memref<3xi32, #tpu.memory_space<smem>>, %arg2: memref<1x16x16xbf16, #tpu.memory_space<vmem>>, %arg3: memref<1x16x8xbf16, #tpu.memory_space<vmem>>, %arg4: memref<8x128xbf16, #tpu.memory_space<vmem>>, %arg5: memref<1x128xf32, #tpu.memory_space<vmem>>, %arg6: memref<128x128xbf16, #tpu.memory_space<vmem>>, %arg7: memref<1x128xf32, #tpu.memory_space<vmem>>, %arg8: memref<2x16xbf16, #tpu.memory_space<vmem>>, %arg9: memref<1x16x128xbf16, #tpu.memory_space<vmem>>, %arg10: memref<1x2x128xbf16, #tpu.memory_space<vmem>>) attributes {dimension_semantics = [#tpu.dimension_semantics<parallel>], iteration_bounds = array<i64: 3>, scalar_prefetch = 1 : i64, scratch_operands = 0 : i64, tpu.core_type = #tpu.core_type<tc>, window_params = [{transform_indices = @transform_0, window_bounds = array<i64: 1, 16, 16>}, {transform_indices = @transform_1, window_bounds = array<i64: 1, 16, 8>}, {pipeline_mode = #tpu.pipeline_mode<synchronous>, transform_indices = @transform_2, window_bounds = array<i64: 8, 128>}, {pipeline_mode = #tpu.pipeline_mode<synchronous>, transform_indices = @transform_3, window_bounds = array<i64: 1, 128>}, {pipeline_mode = #tpu.pipeline_mode<synchronous>, transform_indices = @transform_4, window_bounds = array<i64: 128, 128>}, {pipeline_mode = #tpu.pipeline_mode<synchronous>, transform_indices = @transform_5, window_bounds = array<i64: 1, 128>}, {pipeline_mode = #tpu.pipeline_mode<synchronous>, transform_indices = @transform_6, window_bounds = array<i64: 2, 16>}, {transform_indices = @transform_7, window_bounds = array<i64: 1, 16, 128>}, {transform_indices = @transform_8, window_bounds = array<i64: 1, 2, 128>}]} {
    %c0 = arith.constant 0 : index
    %c0_0 = arith.constant 0 : index
    %c0_1 = arith.constant 0 : index
    %0 = vector.load %arg2[%c0, %c0_0, %c0_1] : memref<1x16x16xbf16, #tpu.memory_space<vmem>>, vector<1x16x16xbf16>
    %1 = vector.shape_cast %0 : vector<1x16x16xbf16> to vector<16x16xbf16>
    %c0_2 = arith.constant 0 : index
    %c0_3 = arith.constant 0 : index
    %c0_4 = arith.constant 0 : index
    %2 = vector.load %arg3[%c0_2, %c0_3, %c0_4] : memref<1x16x8xbf16, #tpu.memory_space<vmem>>, vector<1x16x8xbf16>
    %3 = vector.shape_cast %2 : vector<1x16x8xbf16> to vector<16x8xbf16>
    %c0_5 = arith.constant 0 : index
    %c0_6 = arith.constant 0 : index
    %4 = vector.load %arg4[%c0_5, %c0_6] : memref<8x128xbf16, #tpu.memory_space<vmem>>, vector<8x128xbf16>
    %cst = arith.constant dense<0.000000e+00> : vector<16x128xf32>
    %5 = tpu.matmul %3, %4, %cst {dimension_numbers = #tpu.dot_dimension_numbers<[1], [0], [0], [1], [0, 0, 1, 1], [], []>} : vector<16x8xbf16>, vector<8x128xbf16>, vector<16x128xf32> -> vector<16x128xf32>
    %6 = arith.truncf %5 : vector<16x128xf32> to vector<16x128xbf16>
    %cst_7 = arith.constant dense<0.000000e+00> : vector<16x128xf32>
    %7 = tpu.matmul %1, %6, %cst_7 {dimension_numbers = #tpu.dot_dimension_numbers<[1], [0], [0], [1], [0, 0, 1, 1], [], []>} : vector<16x16xbf16>, vector<16x128xbf16>, vector<16x128xf32> -> vector<16x128xf32>
    %c0_8 = arith.constant 0 : index
    %c0_9 = arith.constant 0 : index
    %8 = vector.load %arg5[%c0_8, %c0_9] : memref<1x128xf32, #tpu.memory_space<vmem>>, vector<1x128xf32>
    %9 = vector.broadcast %8 : vector<1x128xf32> to vector<16x128xf32>
    %10 = arith.addf %7, %9 : vector<16x128xf32>
    %cst_10 = arith.constant 0.000000e+00 : f32
    %11 = vector.broadcast %cst_10 : f32 to vector<16x128xf32>
    %12 = arith.maximumf %10, %11 : vector<16x128xf32>
    %13 = arith.truncf %12 : vector<16x128xf32> to vector<16x128xbf16>
    %c0_11 = arith.constant 0 : index
    %c0_12 = arith.constant 0 : index
    %14 = vector.load %arg6[%c0_11, %c0_12] : memref<128x128xbf16, #tpu.memory_space<vmem>>, vector<128x128xbf16>
    %cst_13 = arith.constant dense<0.000000e+00> : vector<16x128xf32>
    %15 = tpu.matmul %13, %14, %cst_13 {dimension_numbers = #tpu.dot_dimension_numbers<[1], [0], [0], [1], [0, 0, 1, 1], [], []>} : vector<16x128xbf16>, vector<128x128xbf16>, vector<16x128xf32> -> vector<16x128xf32>
    %16 = arith.truncf %15 : vector<16x128xf32> to vector<16x128xbf16>
    %cst_14 = arith.constant dense<0.000000e+00> : vector<16x128xf32>
    %17 = tpu.matmul %1, %16, %cst_14 {dimension_numbers = #tpu.dot_dimension_numbers<[1], [0], [0], [1], [0, 0, 1, 1], [], []>} : vector<16x16xbf16>, vector<16x128xbf16>, vector<16x128xf32> -> vector<16x128xf32>
    %c0_15 = arith.constant 0 : index
    %c0_16 = arith.constant 0 : index
    %18 = vector.load %arg7[%c0_15, %c0_16] : memref<1x128xf32, #tpu.memory_space<vmem>>, vector<1x128xf32>
    %19 = vector.broadcast %18 : vector<1x128xf32> to vector<16x128xf32>
    %20 = arith.addf %17, %19 : vector<16x128xf32>
    %c0_17 = arith.constant 0 : index
    %c0_18 = arith.constant 0 : index
    %21 = vector.load %arg8[%c0_17, %c0_18] : memref<2x16xbf16, #tpu.memory_space<vmem>>, vector<2x16xbf16>
    %22 = arith.truncf %20 : vector<16x128xf32> to vector<16x128xbf16>
    %cst_19 = arith.constant dense<0.000000e+00> : vector<2x128xf32>
    %23 = tpu.matmul %21, %22, %cst_19 {dimension_numbers = #tpu.dot_dimension_numbers<[1], [0], [0], [1], [0, 0, 1, 1], [], []>} : vector<2x16xbf16>, vector<16x128xbf16>, vector<2x128xf32> -> vector<2x128xf32>
    %24 = arith.truncf %20 : vector<16x128xf32> to vector<16x128xbf16>
    %c0_20 = arith.constant 0 : index
    %c0_21 = arith.constant 0 : index
    %c0_22 = arith.constant 0 : index
    %25 = vector.load %arg9[%c0_20, %c0_21, %c0_22] : memref<1x16x128xbf16, #tpu.memory_space<vmem>>, vector<1x16x128xbf16>
    %26 = vector.shape_cast %25 : vector<1x16x128xbf16> to vector<16x128xbf16>
    %27 = vector.shape_cast %24 : vector<16x128xbf16> to vector<1x16x128xbf16>
    tpu.vector_store %arg9[%c0_20, %c0_21, %c0_22], %27 {strides = array<i32>} : memref<1x16x128xbf16, #tpu.memory_space<vmem>>, vector<1x16x128xbf16>,
    %28 = arith.truncf %23 : vector<2x128xf32> to vector<2x128xbf16>
    %c0_23 = arith.constant 0 : index
    %c0_24 = arith.constant 0 : index
    %c0_25 = arith.constant 0 : index
    %29 = vector.load %arg10[%c0_23, %c0_24, %c0_25] : memref<1x2x128xbf16, #tpu.memory_space<vmem>>, vector<1x2x128xbf16>
    %30 = vector.shape_cast %29 : vector<1x2x128xbf16> to vector<2x128xbf16>
    %31 = vector.shape_cast %28 : vector<2x128xbf16> to vector<1x2x128xbf16>
    tpu.vector_store %arg10[%c0_23, %c0_24, %c0_25], %31 {strides = array<i32>} : memref<1x2x128xbf16, #tpu.memory_space<vmem>>, vector<1x2x128xbf16>,
    return
  }
  func.func @transform_0(%arg0: i32, %arg1: memref<3xi32, #tpu.memory_space<smem>>) -> (i32, i32, i32) {
    %0 = arith.index_cast %arg0 : i32 to index
    %1 = memref.load %arg1[%0] : memref<3xi32, #tpu.memory_space<smem>>
    %c0_i32 = arith.constant 0 : i32
    %c0_i32_0 = arith.constant 0 : i32
    %c0_i32_1 = arith.constant 0 : i32
    return %1, %c0_i32, %c0_i32_0 : i32, i32, i32
  }
  func.func @transform_1(%arg0: i32, %arg1: memref<3xi32, #tpu.memory_space<smem>>) -> (i32, i32, i32) {
    %c0_i32 = arith.constant 0 : i32
    %c0_i32_0 = arith.constant 0 : i32
    %c0_i32_1 = arith.constant 0 : i32
    return %arg0, %c0_i32, %c0_i32_0 : i32, i32, i32
  }
  func.func @transform_2(%arg0: i32, %arg1: memref<3xi32, #tpu.memory_space<smem>>) -> (i32, i32) {
    %c0_i32 = arith.constant 0 : i32
    %c0_i32_0 = arith.constant 0 : i32
    %c0_i32_1 = arith.constant 0 : i32
    return %c0_i32, %c0_i32_0 : i32, i32
  }
  func.func @transform_3(%arg0: i32, %arg1: memref<3xi32, #tpu.memory_space<smem>>) -> (i32, i32) {
    %c0_i32 = arith.constant 0 : i32
    %c0_i32_0 = arith.constant 0 : i32
    %c0_i32_1 = arith.constant 0 : i32
    return %c0_i32, %c0_i32_0 : i32, i32
  }
  func.func @transform_4(%arg0: i32, %arg1: memref<3xi32, #tpu.memory_space<smem>>) -> (i32, i32) {
    %c0_i32 = arith.constant 0 : i32
    %c0_i32_0 = arith.constant 0 : i32
    %c0_i32_1 = arith.constant 0 : i32
    return %c0_i32, %c0_i32_0 : i32, i32
  }
  func.func @transform_5(%arg0: i32, %arg1: memref<3xi32, #tpu.memory_space<smem>>) -> (i32, i32) {
    %c0_i32 = arith.constant 0 : i32
    %c0_i32_0 = arith.constant 0 : i32
    %c0_i32_1 = arith.constant 0 : i32
    return %c0_i32, %c0_i32_0 : i32, i32
  }
  func.func @transform_6(%arg0: i32, %arg1: memref<3xi32, #tpu.memory_space<smem>>) -> (i32, i32) {
    %c0_i32 = arith.constant 0 : i32
    %c0_i32_0 = arith.constant 0 : i32
    %c0_i32_1 = arith.constant 0 : i32
    return %c0_i32, %c0_i32_0 : i32, i32
  }
  func.func @transform_7(%arg0: i32, %arg1: memref<3xi32, #tpu.memory_space<smem>>) -> (i32, i32, i32) {
    %c0_i32 = arith.constant 0 : i32
    %c0_i32_0 = arith.constant 0 : i32
    %c0_i32_1 = arith.constant 0 : i32
    return %arg0, %c0_i32, %c0_i32_0 : i32, i32, i32
  }
  func.func @transform_8(%arg0: i32, %arg1: memref<3xi32, #tpu.memory_space<smem>>) -> (i32, i32, i32) {
    %c0_i32 = arith.constant 0 : i32
    %c0_i32_0 = arith.constant 0 : i32
    %c0_i32_1 = arith.constant 0 : i32
    return %arg0, %c0_i32, %c0_i32_0 : i32, i32, i32
  }
}

</mosaic_0001>

<bundles_post_ra>
// kernel: tpu_custom_call.1
= control target key start
LH: loop header
LB: loop body
LE: loop exit
PB: predicated region body
PF: predicated region fallthrough
CT: control target
= control target key end

     0   :  { %s1410_s0 = inlined_call_operand.vmem [shape: s32[3], index: 0, kind: input, shape index: {}]   ;;  %s1411_s1 = inlined_call_operand.vmem [shape: bf16[2,16,16], index: 1, kind: input, shape index: {}]   ;;  %s1412_s2 = inlined_call_operand.vmem [shape: bf16[3,16,8], index: 2, kind: input, shape index: {}]   ;;  %s1413_s3 = inlined_call_operand.vmem [shape: bf16[8,128], index: 3, kind: input, shape index: {}]   ;;  %s1414_s4 = inlined_call_operand.vmem [shape: f32[1,128], index: 4, kind: input, shape index: {}]   ;;  %s1415_s5 = inlined_call_operand.hbm [shape: bf16[128,128], index: 5, kind: input, shape index: {}]   ;;  %s1416_s6 = inlined_call_operand.vmem [shape: f32[1,128], index: 6, kind: input, shape index: {}]   ;;  %s1417_s7 = inlined_call_operand.vmem [shape: bf16[2,16], index: 7, kind: input, shape index: {}]   ;;  %s1418_s8 = inlined_call_operand.hbm [shape: bf16[3,16,128], index: 8, kind: output, shape index: {0}]   ;;  %s1419_s9 = inlined_call_operand.hbm [shape: bf16[3,2,128], index: 9, kind: output, shape index: {1}]  }
   0x1   :  { %s15_s11 = sshll.u32 %s1410_s0, 4  ;;  %s16_s11 = int_to_ptr.vmem [resolvable:$true] %s15_s11 }
   0x2   :  { %s1017_s12 = scalar_lea.vmem %s16_s11, 16  ;;  %p1022_p1 = scmp.lt.s32.totalorder %s16_s11, %s16_s11 }
   0x3   :  { %p1018_p0 = scmp.ne.s32.totalorder %s16_s11, %s1017_s12  ;;  %p1023_p2 = scmp.lt.s32.totalorder %s1017_s12, %s1017_s12 }
   0x5   :  { %p1024_p3 = por %p1023_p2, %p1022_p1 }
   0x7   :  { %p1025_p4 = pnand %p1024_p3, %p1018_p0 }
   0x9   :  { %1028 = shalt.err (!%p1025_p4)  }
   0xa   :  { %s1153_s13 = smov [#allocation3]  }
   0xb   :  { %18 = dma.vmem_to_smem %s16_s11, 16, %s1153_s13, [#allocation2] }
   0xc   :  { %1123 = dma.done.wait [#allocation2], 16 }
   0xd   :  { %1124 = vsyncadd [#allocation2], 4294967280 }
   0xe   :  { %20 = sfence }
   0xf   :  { %21 = vsyncpa [#allocation5], 0 }
  0x10   :  { %22 = vsyncpa [#allocation6], 0 }
  0x11   :  { %24 = vsyncpa [#allocation6 + $0x1], 0 }
  0x12   :  { %25 = vsyncpa [#allocation9], 0 }
  0x13   :  { %27 = vsyncpa [#allocation9 + $0x1], 0  ;;  %s1216_s14 = smov 0   ;;  %s1218_s0 = smov 0  }
  0x14   :  { %s1220_s15 = smov 0   ;;  %s1222_s16 = smov 0  }
  0x15 LB: > { %s1237_s17 = sadd.s32 4294967295, %s1151_s16   ;;  %s839_s18 = sadd.s32 4294967294, %s1151_s16   ;;  %s1151_s16 = sphi %s1222_s16, %s1427_s16   ;;  %s1147_s15 = sphi %s1220_s15, %s1426_s15   ;;  %s1143_s0 = sphi %s1218_s0, %s1425_s0   ;;  %s1139_s14 = sphi %s1216_s14, %s1424_s14  }
  0x16   : > { %s1241_s19 = sadd.s32 1, %s1151_s16   ;;  %s199_s20 = sadd.s32 1, %s1147_s15 }
  0x17   : > { %s196_s21 = ssub.s32 %s1151_s16, %s1241_s19  ;;  %p209_p5 = scmp.ne.s32.totalorder %s1147_s15, %s1143_s0 }
  0x18   : > { %p197_p6 = scmp.eq.s32.totalorder %s196_s21, 0  ;;  %p210_p7 = scmp.eq.s32.totalorder %s1237_s17, 2 }
  0x19   : > { %p215_p8 = scmp.ne.s32.totalorder %s1143_s0, %s1139_s14  ;;  %p216_p9 = scmp.eq.s32.totalorder %s839_s18, 2 }
  0x1a   : > { %s1252_s22 = scalar_select %p197_p6, %s1147_s15, %s199_s20  }
  0x1b   : > { %p1254_p10 = por %p210_p7, %p209_p5  ;;  %p1258_p11 = por %p216_p9, %p215_p8 }
  0x1c   : > { %p840_p12 = scmp.ge.s32.totalorder %s1151_s16, 1  ;;  %p249_p13 = scmp.lt.s32.totalorder %s1151_s16, 4 }
  0x1d   : > { %s1421_s24 = scalar_select %p1258_p11, 1, 0 }
  0x1e   : > { %p964_p0 = scmp.eq.s32.totalorder %s1237_s17, 0  ;;  %p1265_p1 = pnand %p840_p12, %p249_p13 }
  0x1f   : > { %s1154_s26 = smov [#allocation4]  }
  0x20   : > { %s267_s27 = sshll.u32 %s1154_s26, 4  ;;  %p953_p2 = pneg %p1265_p1  ;;  %s268_s27 = int_to_ptr.vmem [resolvable:$true] %s267_s27 }
  0x21   : > { %s1040_s28 = scalar_lea.vmem %s268_s27, 1024  ;;  %p1048_p8 = scmp.lt.s32.totalorder %s268_s27, %s268_s27 }
  0x22   : > { %p954_p3 = pnand %p964_p0, %p953_p2  ;;  %p1041_p5 = scmp.ne.s32.totalorder %s268_s27, %s1040_s28 }
  0x23   : > { %p1049_p9 = scmp.lt.s32.totalorder %s1040_s28, %s1040_s28 }
  0x24   : > { %p1031_p4 = pneg %p954_p3 }
  0x25   : > { %p1050_p11 = por %p1049_p9, %p1048_p8 }
  0x26   : > { %p1043_p6 = pnand %p1041_p5, %p1031_p4 }
  0x28   : > { %p1044_p7 = pneg %p1043_p6 }
  0x2a   : > { %p1051_p12 = pnand %p1050_p11, %p1044_p7 }
  0x2c   : > { %1054 = shalt.err (!%p1051_p12)
}
  0x2d   : > { %s1155_s29 = smov 64   ;;  %s1156_s30 = smov 4  }
  0x2e   : > { %956 = dma.hbm_to_vmem [thread:$0]  (!%p954_p3), %s1415_s5, 1024, %s268_s27, [#allocation5], %s1155_s29, %s1155_s29, %s1156_s30  }
  0x2f   : > { %307 = sbr.rel (%p1265_p1) target bundleno = 1080 (0x438), region = 48 }
  0x34   : > { %1126 = dma.done.wait (%p964_p0), [#allocation5], 1024  }
  0x35   : > { %1128 = vsyncadd (%p964_p0), [#allocation5], 4294966272  ;;  %p358_p13 = scmp.lt.s32.totalorder %s1237_s17, 2  ;;  %v1157_v0 = vmov 0.0   ;;  %vm1158_vm0 = vmmov 0   ;;  %vm378_vm1 = vcmask 1043456  }
  0x36   : > { %901 = vmatprep.subr.bf16.mxu1 %v1157_v0  ;;  %903 = vmatprep.mubr.msk.bf16.mxu1 %vm1158_vm0, %v1157_v0  ;;  %vm374_vm2 = vcmask 64512   ;;  %v368_v1 = vld [vmem:[%s1413_s3] sm:$0xf]  ;;  %s351_s27 = sld [smem:[#allocation3 + %s1237_s17]]  ;;  %v1009_v4 = vld [vmem:[#allocation4 + $0x38] sm:$0xff]   ;;  %v1010_v5 = vld [vmem:[#allocation4 + $0x30] sm:$0xff]  }
  0x37   : > { %s359_s12 = scalar_select %p358_p13, %s1237_s17, 2  ;;  %913 = vmatprep.subr.bf16.mxu0 %v1157_v0  ;;  %929 = vmatprep.mubr.msk.bf16.mxu0 %vm1158_vm0, %v1157_v0  ;;  %v380_v2 = vsel %vm378_vm1, %v368_v1, 0  ;;  %v1011_v6 = vld [vmem:[#allocation4 + $0x28] sm:$0xff]   ;;  %v1012_v7 = vld [vmem:[#allocation4 + $0x20] sm:$0xff]   ;;  %v1013_v8 = vld [vmem:[#allocation4 + $0x18] sm:$0xff]   ;;  %vm436_vm3 = vcmask 130048  }
  0x38   : > { %902 = vmatpush3.bf16.msra.mxu1 %v380_v2  ;;  %914 = vmatpush3.bf16.msra.mxu0 %v1009_v4  ;;  %v1014_v15 = vld [vmem:[#allocation4 + $0x10] sm:$0xff]   ;;  %v1015_v16 = vld [vmem:[#allocation4 + $0x8] sm:$0xff]   ;;  %v1016_v17 = vld [vmem:[#allocation4] sm:$0xff]   ;;  %s878_s29 = sshll.u32 %s1237_s17, 7  ;;  %s1159_s20 = smov [#allocation7]  }
  0x39   : > { %s875_s13 = sshll.u32 %s359_s12, 3  ;;  %907 = vmatprep.subr.bf16.mxu1 %v1157_v0  ;;  %915 = vmatprep.subr.bf16.mxu0 %v1157_v0  ;;  %v852_v18 = vld [vmem:[%s1414_s4] ss:$0 sm:$0xff]  ;;  %s1338_s11 = scalar_lea.hbm %s1418_s8, %s878_s29 }
  0x3a   : > { %s362_s21 = scalar_lea.vmem %s1412_s2, %s875_s13  ;;  %s1322_s13 = sand.u32 1, %s1143_s0   ;;  %v863_v34 = vld [vmem:[%s1416_s6] ss:$0 sm:$0xff] }
  0x3b   : > { %v1007_v3 = vld [vmem:[%s362_s21] sm:$0xff]   ;;  %s845_s21 = sshll.u32 %s1322_s13, 3  ;;  %s695_s12 = scalar_lea.sflag [#allocation6], %s1322_s13 }
  0x3c   : > { %904 = vmatmul.mubr.msk.bf16.vlgmr.msra.gmra.mxu1 %vm374_vm2, %v1007_v3  ;;  %p352_p11 = scmp.lt.s32.totalorder %s351_s27, 1  ;;  %916 = vmatpush3.bf16.msra.mxu0 %v1010_v5  ;;  %s344_s25 = scalar_lea.vmem [#allocation7], %s845_s21  ;;  %v638_v41 = vld [vmem:[%s1417_s7] sm:$0x1] }
  0x3d   : > { %909 = vmatprep.mubr.msk.bf16.mxu1 %vm1158_vm0, %v1157_v0  ;;  %917 = vmatprep.subr.bf16.mxu0 %v1157_v0  ;;  %s1059_s21 = sshll.u32 %s1159_s20, 4  ;;  %s1060_s21 = int_to_ptr.vmem [resolvable:$false] %s1059_s21 }
  0x3e   : > { %s1429_s27 = smov (!%p352_p11, %s351_s27), 1 }
  0x3f   : > { %s874_s28 = sshll.u32 %s1429_s27, 3 }
  0x40   : > { %s356_s10 = scalar_lea.vmem %s1411_s1, %s874_s28  ;;  %918 = vmatpush3.bf16.msra.mxu0 %v1011_v6  ;;  %s712_s28 = sshll.u32 %s344_s25, 4  ;;  %s1332_s28 = int_to_ptr.vmem [resolvable:$true] %s712_s28 }
  0x41   : > { %919 = vmatprep.subr.bf16.mxu0 %v1157_v0  ;;  %v1008_v14 = vld [vmem:[%s356_s10] sm:$0xff]   ;;  %s1055_s18 = scalar_lea.vmem %s1332_s28, 128  ;;  %p1062_p3 = scmp.lt.s32.totalorder %s1332_s28, %s1060_s21 }
  0x42   : > { %p1056_p0 = scmp.ne.s32.totalorder %s1332_s28, %s1055_s18 }
  0x44   : > { %920 = vmatpush3.bf16.msra.mxu0 %v1012_v7  ;;  %p1057_p1 = pnand %p1056_p0, %p1254_p10 }
  0x45   : > { %921 = vmatprep.subr.bf16.mxu0 %v1157_v0 }
  0x46   : > { %p1058_p2 = pneg %p1057_p1 }
  0x48   : > { %922 = vmatpush3.bf16.msra.mxu0 %v1013_v8 }
  0x49   : > { %923 = vmatprep.subr.bf16.mxu0 %v1157_v0 }
  0x4c   : > { %924 = vmatpush3.bf16.msra.mxu0 %v1014_v15 }
  0x4d   : > { %925 = vmatprep.subr.bf16.mxu0 %v1157_v0 }
  0x50   : > { %926 = vmatpush3.bf16.msra.mxu0 %v1015_v16 }
  0x51   : > { %927 = vmatprep.subr.bf16.mxu0 %v1157_v0 }
  0x54   : > { %928 = vmatpush3.bf16.msra.mxu0 %v1016_v17 }
  0xfc   : > { %v416_v9 = vpop.f32.mrf.mxu1 }
  0xfe   : > { %v905_v10 = vpop.f32.mrf.mxu1 }
 0x100   : > { %v419_v11 = vpop.f32.mrf.mxu1 }
 0x101   : > { %v423_v12 = vpack.c.bf16 %v419_v11, %v416_v9 }
 0x102   : > { %v906_v13 = vpop.f32.mrf.mxu1 }
 0x103   : > { %908 = vmatpush3.bf16.msra.mxu1 %v423_v12 }
 0x104   : > { %933 = vmatprep.subr.bf16.mxu1 %v1157_v0 }
 0x106   : > { %910 = vmatmul.mubr.msk.bf16.vlgmr.msra.gmra.mxu1 %vm436_vm3, %v1008_v14 }
 0x107   : > { %935 = vmatprep.mubr.msk.bf16.mxu1 %vm1158_vm0, %v1157_v0 }
 0x1c6   : > { %v474_v19 = vpop.f32.mrf.mxu1 }
 0x1c7   : > { %v475_v21 = vadd.f32 %v852_v18, %v474_v19 }
 0x1c8   : > { %v911_v20 = vpop.f32.mrf.mxu1 }
 0x1c9   : > { %v481_v25 = vmax.f32 %v475_v21, 0.0 }
 0x1ca   : > { %v477_v22 = vpop.f32.mrf.mxu1 }
 0x1cb   : > { %v478_v23 = vadd.f32 %v852_v18, %v477_v22 }
 0x1cc   : > { %v912_v24 = vpop.f32.mrf.mxu1 }
 0x1cd   : > { %v482_v26 = vmax.f32 %v478_v23, 0.0 }
 0x1cf   : > { %v483_v27 = vpack.c.bf16 %v482_v26, %v481_v25 }
 0x1d1   : > { %930 = vmatmul.mubr.bf16.vlgmr.msra.gmra.mxu0 %v483_v27 }
 0x291   : > { %v582_v28 = vpop.f32.mrf.mxu0 }
 0x293   : > { %v931_v29 = vpop.f32.mrf.mxu0 }
 0x295   : > { %v585_v30 = vpop.f32.mrf.mxu0 }
 0x296   : > { %v589_v31 = vpack.c.bf16 %v585_v30, %v582_v28 }
 0x297   : > { %v932_v32 = vpop.f32.mrf.mxu0 }
 0x298   : > { %934 = vmatpush3.bf16.msra.mxu1 %v589_v31 }
 0x299   : > { %939 = vmatprep.subr.bf16.mxu1 %v1157_v0 }
 0x29b   : > { %936 = vmatmul.mubr.msk.bf16.vlgmr.msra.gmra.mxu1 %vm436_vm3, %v1008_v14 }
 0x29c   : > { %941 = vmatprep.mubr.msk.bf16.mxu1 %vm1158_vm0, %v1157_v0 }
 0x35b   : > { %v631_v33 = vpop.f32.mrf.mxu1 }
 0x35c   : > { %v632_v37 = vadd.f32 %v863_v34, %v631_v33 }
 0x35d   : > { %v937_v35 = vpop.f32.mrf.mxu1 }
 0x35f   : > { %v634_v36 = vpop.f32.mrf.mxu1 }
 0x360   : > { %v635_v38 = vadd.f32 %v863_v34, %v634_v36 }
 0x361   : > { %v938_v39 = vpop.f32.mrf.mxu1 }
 0x362   : > { %v639_v40 = vpack.c.bf16 %v635_v38, %v632_v37 }
 0x364   : > { %883 = vst [vmem:[%s344_s25] sm:$0xff] %v639_v40   ;;  %940 = vmatpush3.bf16.msra.mxu1 %v639_v40  ;;  %s1061_s25 = scalar_lea.vmem %s1060_s21, 256 }
 0x365   : > { %p1063_p4 = scmp.lt.s32.totalorder %s1061_s25, %s1055_s18 }
 0x367   : > { %942 = vmatmul.mubr.msk.bf16.vlgmr.msra.gmra.mxu1 %vm436_vm3, %v638_v41  ;;  %p1064_p5 = por %p1063_p4, %p1062_p3 }
 0x369   : > { %p1065_p6 = pnand %p1064_p5, %p1058_p2 }
 0x36b   : > { %1068 = shalt.err (!%p1065_p6)
}
 0x36c   : > { %s1069_s26 = scalar_lea.hbm %s1338_s11, 128  ;;  %s1073_s30 = scalar_lea.hbm %s1418_s8, 384 }
 0x36d   : > { %p1070_p7 = scmp.ne.s32.totalorder %s1338_s11, %s1069_s26  ;;  %p1074_p12 = scmp.lt.s32.totalorder %s1338_s11, %s1418_s8 }
 0x36e   : > { %p1075_p13 = scmp.lt.s32.totalorder %s1073_s30, %s1069_s26 }
 0x36f   : > { %p1071_p8 = pnand %p1070_p7, %p1254_p10 }
 0x370   : > { %p1076_p11 = por %p1075_p13, %p1074_p12 }
 0x371   : > { %p1072_p9 = pneg %p1071_p8 }
 0x373   : > { %p1077_p0 = pnand %p1076_p11, %p1072_p9 }
 0x375   : > { %1080 = shalt.err (!%p1077_p0)
}
 0x376   : > { %s1160_s18 = smov 64   ;;  %s1161_s21 = smov 4  }
 0x377   : > { %949 = dma.vmem_to_hbm [thread:$0]  (%p1254_p10), %s1332_s28, 128, %s1338_s11, %s695_s12, %s1160_s18, %s1160_s18, %s1161_s21  }
 0x378   : > { %s871_s25 = sshll.u32 %s1237_s17, 4  ;;  %s350_s27 = scalar_lea.vmem [#allocation8], %s1322_s13 }
 0x379   : > { %s728_s29 = sshll.u32 %s350_s27, 4  ;;  %s1368_s10 = scalar_lea.hbm %s1419_s9, %s871_s25  ;;  %s1370_s29 = int_to_ptr.vmem [resolvable:$true] %s728_s29 }
 0x37a   : > { %s700_s20 = scalar_lea.sflag [#allocation9], %s1322_s13  ;;  %s1081_s28 = scalar_lea.vmem %s1370_s29, 16 }
 0x37b   : > { %p1082_p1 = scmp.ne.s32.totalorder %s1370_s29, %s1081_s28  ;;  %s1162_s17 = smov [#allocation8]  }
 0x37c   : > { %s1085_s11 = sshll.u32 %s1162_s17, 4  ;;  %s1086_s11 = int_to_ptr.vmem [resolvable:$false] %s1085_s11 }
 0x37d   : > { %p1083_p2 = pnand %p1082_p1, %p1254_p10  ;;  %s1087_s12 = scalar_lea.vmem %s1086_s11, 32 }
 0x37e   : > { %p1088_p4 = scmp.lt.s32.totalorder %s1370_s29, %s1086_s11  ;;  %p1089_p5 = scmp.lt.s32.totalorder %s1087_s12, %s1081_s28 }
 0x37f   : > { %p1084_p3 = pneg %p1083_p2 }
 0x380   : > { %p1090_p6 = por %p1089_p5, %p1088_p4 }
 0x382   : > { %p1091_p7 = pnand %p1090_p6, %p1084_p3 }
 0x427   : > { %v677_v42 = vpop.f32.mrf.mxu1 }
 0x428   : > { %v692_v43 = vpack.c.bf16 %v677_v42, %v677_v42 }
 0x429   : > { %v943_v44 = vpop.f32.mrf.mxu1 }
 0x42a   : > { %693 = vst [vmem:[%s350_s27] sm:$0x1] %v692_v43 }
 0x42b   : > { %v680_v45 = vpop.f32.mrf.mxu1 }
 0x42c   : > { %1094 = shalt.err (!%p1091_p7)
}
 0x42d   : > { %s1095_s18 = scalar_lea.hbm %s1368_s10, 16  ;;  %s1099_s25 = scalar_lea.hbm %s1419_s9, 48 }
 0x42e   : > { %p1096_p8 = scmp.ne.s32.totalorder %s1368_s10, %s1095_s18  ;;  %p1100_p13 = scmp.lt.s32.totalorder %s1368_s10, %s1419_s9 }
 0x42f   : > { %p1101_p11 = scmp.lt.s32.totalorder %s1099_s25, %s1095_s18 }
 0x430   : > { %p1097_p9 = pnand %p1096_p8, %p1254_p10 }
 0x431   : > { %p1102_p0 = por %p1101_p11, %p1100_p13 }
 0x432   : > { %p1098_p12 = pneg %p1097_p9 }
 0x434   : > { %p1103_p1 = pnand %p1102_p0, %p1098_p12 }
 0x436   : > { %1106 = shalt.err (!%p1103_p1)
}
 0x437   : > { %950 = dma.vmem_to_hbm [thread:$0]  (%p1254_p10), %s1370_s29, 16, %s1368_s10, %s700_s20   ;;  %v944_v46 = vpop.f32.mrf.mxu1 }
 0x438 PF: > { %p966_p2 = scmp.ge.s32.totalorder %s1151_s16, 2  ;;  %s740_s30 = sand.u32 1, %s1139_s14  }
 0x439   : > { %p1423_p3 = scmp.ne.s32.totalorder %s1421_s24, 0  ;;  %s741_s28 = scalar_lea.sflag [#allocation6], %s740_s30 }
 0x43b   : > { %p958_p4 = pnand %p966_p2, %p1423_p3 }
 0x43d   : > { %p959_p5 = pneg %p958_p4 }
 0x43f   : > { %1130 = dma.done.wait (%p959_p5), %s741_s28, 128  }
 0x440   : > { %1132 = vsyncadd (%p959_p5), %s741_s28, 4294967168  ;;  %s750_s17 = scalar_lea.sflag [#allocation9], %s740_s30 }
 0x441   : > { %1134 = dma.done.wait (%p959_p5), %s750_s17, 16  }
 0x442   : > { %1136 = vsyncadd (%p959_p5), %s750_s17, 4294967280  ;;  %p30_p10 = scmp.ge.s32.totalorder %s1241_s19, 5   ;;  %s1424_s14 = smov %s1143_s0 }
 0x443   : > { %s1425_s0 = smov %s1147_s15  ;;  %s1426_s15 = smov %s1252_s22 }
 0x444   : > { %s1427_s16 = smov %s1241_s19  ;;  %32 = sbr.rel (!%p30_p10) target bundleno = 21 (0x15), region = 108 }
 0x449   :  { %754 = vsyncpa [#allocation5], 1 }
 0x44a   :  { %756 = vsyncpa [#allocation5 + $0x1], 1 }
 0x44b   :  { %757 = vsyncpa [#allocation6], 1 }
 0x44c   :  { %759 = vsyncpa [#allocation6 + $0x1], 1 }
 0x44d   :  { %760 = vsyncpa [#allocation9], 1 }
 0x44e   :  { %762 = vsyncpa [#allocation9 + $0x1], 1 }

// kernel: tpu_custom_call.1
= control target key start
LH: loop header
LB: loop body
LE: loop exit
PB: predicated region body
PF: predicated region fallthrough
CT: control target
= control target key end

     0   :  { %s1410_s0 = inlined_call_operand.vmem [shape: s32[3], index: 0, kind: input, shape index: {}]   ;;  %s1411_s1 = inlined_call_operand.vmem [shape: bf16[2,16,16], index: 1, kind: input, shape index: {}]   ;;  %s1412_s2 = inlined_call_operand.vmem [shape: bf16[3,16,8], index: 2, kind: input, shape index: {}]   ;;  %s1413_s3 = inlined_call_operand.vmem [shape: bf16[8,128], index: 3, kind: input, shape index: {}]   ;;  %s1414_s4 = inlined_call_operand.vmem [shape: f32[1,128], index: 4, kind: input, shape index: {}]   ;;  %s1415_s5 = inlined_call_operand.hbm [shape: bf16[128,128], index: 5, kind: input, shape index: {}]   ;;  %s1416_s6 = inlined_call_operand.vmem [shape: f32[1,128], index: 6, kind: input, shape index: {}]   ;;  %s1417_s7 = inlined_call_operand.vmem [shape: bf16[2,16], index: 7, kind: input, shape index: {}]   ;;  %s1418_s8 = inlined_call_operand.hbm [shape: bf16[3,16,128], index: 8, kind: output, shape index: {0}]   ;;  %s1419_s9 = inlined_call_operand.hbm [shape: bf16[3,2,128], index: 9, kind: output, shape index: {1}]  }
   0x1   :  { %s15_s11 = sshll.u32 %s1410_s0, 4  ;;  %s16_s11 = int_to_ptr.vmem [resolvable:$true] %s15_s11 }
   0x2   :  { %s1017_s12 = scalar_lea.vmem %s16_s11, 16  ;;  %p1022_p1 = scmp.lt.s32.totalorder %s16_s11, %s16_s11 }
   0x3   :  { %p1018_p0 = scmp.ne.s32.totalorder %s16_s11, %s1017_s12  ;;  %p1023_p2 = scmp.lt.s32.totalorder %s1017_s12, %s1017_s12 }
   0x5   :  { %p1024_p3 = por %p1023_p2, %p1022_p1 }
   0x7   :  { %p1025_p4 = pnand %p1024_p3, %p1018_p0 }
   0x9   :  { %1028 = shalt.err (!%p1025_p4)  }
   0xa   :  { %s1153_s13 = smov [#allocation3]  }
   0xb   :  { %18 = dma.vmem_to_smem %s16_s11, 16, %s1153_s13, [#allocation2] }
   0xc   :  { %1123 = dma.done.wait [#allocation2], 16 }
   0xd   :  { %1124 = vsyncadd [#allocation2], 4294967280 }
   0xe   :  { %20 = sfence }
   0xf   :  { %21 = vsyncpa [#allocation5], 0 }
  0x10   :  { %22 = vsyncpa [#allocation6], 0 }
  0x11   :  { %24 = vsyncpa [#allocation6 + $0x1], 0 }
  0x12   :  { %25 = vsyncpa [#allocation9], 0 }
  0x13   :  { %27 = vsyncpa [#allocation9 + $0x1], 0  ;;  %s1216_s14 = smov 0   ;;  %s1218_s0 = smov 0  }
  0x14   :  { %s1220_s15 = smov 0   ;;  %s1222_s16 = smov 0  }
  0x15 LB: > { %s1237_s17 = sadd.s32 4294967295, %s1151_s16   ;;  %s839_s18 = sadd.s32 4294967294, %s1151_s16   ;;  %s1151_s16 = sphi %s1222_s16, %s1427_s16   ;;  %s1147_s15 = sphi %s1220_s15, %s1426_s15   ;;  %s1143_s0 = sphi %s1218_s0, %s1425_s0   ;;  %s1139_s14 = sphi %s1216_s14, %s1424_s14  }
  0x16   : > { %s1241_s19 = sadd.s32 1, %s1151_s16   ;;  %s199_s20 = sadd.s32 1, %s1147_s15 }
  0x17   : > { %s196_s21 = ssub.s32 %s1151_s16, %s1241_s19  ;;  %p209_p5 = scmp.ne.s32.totalorder %s1147_s15, %s1143_s0 }
  0x18   : > { %p197_p6 = scmp.eq.s32.totalorder %s196_s21, 0  ;;  %p210_p7 = scmp.eq.s32.totalorder %s1237_s17, 2 }
  0x19   : > { %p215_p8 = scmp.ne.s32.totalorder %s1143_s0, %s1139_s14  ;;  %p216_p9 = scmp.eq.s32.totalorder %s839_s18, 2 }
  0x1a   : > { %s1252_s22 = scalar_select %p197_p6, %s1147_s15, %s199_s20  }
  0x1b   : > { %p1254_p10 = por %p210_p7, %p209_p5  ;;  %p1258_p11 = por %p216_p9, %p215_p8 }
  0x1c   : > { %p840_p12 = scmp.ge.s32.totalorder %s1151_s16, 1  ;;  %p249_p13 = scmp.lt.s32.totalorder %s1151_s16, 4 }
  0x1d   : > { %s1421_s24 = scalar_select %p1258_p11, 1, 0 }
  0x1e   : > { %p964_p0 = scmp.eq.s32.totalorder %s1237_s17, 0  ;;  %p1265_p1 = pnand %p840_p12, %p249_p13 }
  0x1f   : > { %s1154_s26 = smov [#allocation4]  }
  0x20   : > { %s267_s27 = sshll.u32 %s1154_s26, 4  ;;  %p953_p2 = pneg %p1265_p1  ;;  %s268_s27 = int_to_ptr.vmem [resolvable:$true] %s267_s27 }
  0x21   : > { %s1040_s28 = scalar_lea.vmem %s268_s27, 1024  ;;  %p1048_p8 = scmp.lt.s32.totalorder %s268_s27, %s268_s27 }
  0x22   : > { %p954_p3 = pnand %p964_p0, %p953_p2  ;;  %p1041_p5 = scmp.ne.s32.totalorder %s268_s27, %s1040_s28 }
  0x23   : > { %p1049_p9 = scmp.lt.s32.totalorder %s1040_s28, %s1040_s28 }
  0x24   : > { %p1031_p4 = pneg %p954_p3 }
  0x25   : > { %p1050_p11 = por %p1049_p9, %p1048_p8 }
  0x26   : > { %p1043_p6 = pnand %p1041_p5, %p1031_p4 }
  0x28   : > { %p1044_p7 = pneg %p1043_p6 }
  0x2a   : > { %p1051_p12 = pnand %p1050_p11, %p1044_p7 }
  0x2c   : > { %1054 = shalt.err (!%p1051_p12)
}
  0x2d   : > { %s1155_s29 = smov 64   ;;  %s1156_s30 = smov 4  }
  0x2e   : > { %956 = dma.hbm_to_vmem [thread:$0]  (!%p954_p3), %s1415_s5, 1024, %s268_s27, [#allocation5], %s1155_s29, %s1155_s29, %s1156_s30  }
  0x2f   : > { %307 = sbr.rel (%p1265_p1) target bundleno = 1080 (0x438), region = 48 }
  0x34   : > { %1126 = dma.done.wait (%p964_p0), [#allocation5], 1024  }
  0x35   : > { %1128 = vsyncadd (%p964_p0), [#allocation5], 4294966272  ;;  %p358_p13 = scmp.lt.s32.totalorder %s1237_s17, 2  ;;  %v1157_v0 = vmov 0.0   ;;  %vm1158_vm0 = vmmov 0   ;;  %vm378_vm1 = vcmask 1043456  }
  0x36   : > { %901 = vmatprep.subr.bf16.mxu1 %v1157_v0  ;;  %903 = vmatprep.mubr.msk.bf16.mxu1 %vm1158_vm0, %v1157_v0  ;;  %vm374_vm2 = vcmask 64512   ;;  %v368_v1 = vld [vmem:[%s1413_s3] sm:$0xf]  ;;  %s351_s27 = sld [smem:[#allocation3 + %s1237_s17]]  ;;  %v1009_v4 = vld [vmem:[#allocation4 + $0x38] sm:$0xff]   ;;  %v1010_v5 = vld [vmem:[#allocation4 + $0x30] sm:$0xff]  }
  0x37   : > { %s359_s12 = scalar_select %p358_p13, %s1237_s17, 2  ;;  %913 = vmatprep.subr.bf16.mxu0 %v1157_v0  ;;  %929 = vmatprep.mubr.msk.bf16.mxu0 %vm1158_vm0, %v1157_v0  ;;  %v380_v2 = vsel %vm378_vm1, %v368_v1, 0  ;;  %v1011_v6 = vld [vmem:[#allocation4 + $0x28] sm:$0xff]   ;;  %v1012_v7 = vld [vmem:[#allocation4 + $0x20] sm:$0xff]   ;;  %v1013_v8 = vld [vmem:[#allocation4 + $0x18] sm:$0xff]   ;;  %vm436_vm3 = vcmask 130048  }
  0x38   : > { %902 = vmatpush3.bf16.msra.mxu1 %v380_v2  ;;  %914 = vmatpush3.bf16.msra.mxu0 %v1009_v4  ;;  %v1014_v15 = vld [vmem:[#allocation4 + $0x10] sm:$0xff]   ;;  %v1015_v16 = vld [vmem:[#allocation4 + $0x8] sm:$0xff]   ;;  %v1016_v17 = vld [vmem:[#allocation4] sm:$0xff]   ;;  %s878_s29 = sshll.u32 %s1237_s17, 7  ;;  %s1159_s20 = smov [#allocation7]  }
  0x39   : > { %s875_s13 = sshll.u32 %s359_s12, 3  ;;  %907 = vmatprep.subr.bf16.mxu1 %v1157_v0  ;;  %915 = vmatprep.subr.bf16.mxu0 %v1157_v0  ;;  %v852_v18 = vld [vmem:[%s1414_s4] ss:$0 sm:$0xff]  ;;  %s1338_s11 = scalar_lea.hbm %s1418_s8, %s878_s29 }
  0x3a   : > { %s362_s21 = scalar_lea.vmem %s1412_s2, %s875_s13  ;;  %s1322_s13 = sand.u32 1, %s1143_s0   ;;  %v863_v34 = vld [vmem:[%s1416_s6] ss:$0 sm:$0xff] }
  0x3b   : > { %v1007_v3 = vld [vmem:[%s362_s21] sm:$0xff]   ;;  %s845_s21 = sshll.u32 %s1322_s13, 3  ;;  %s695_s12 = scalar_lea.sflag [#allocation6], %s1322_s13 }
  0x3c   : > { %904 = vmatmul.mubr.msk.bf16.vlgmr.msra.gmra.mxu1 %vm374_vm2, %v1007_v3  ;;  %p352_p11 = scmp.lt.s32.totalorder %s351_s27, 1  ;;  %916 = vmatpush3.bf16.msra.mxu0 %v1010_v5  ;;  %s344_s25 = scalar_lea.vmem [#allocation7], %s845_s21  ;;  %v638_v41 = vld [vmem:[%s1417_s7] sm:$0x1] }
  0x3d   : > { %909 = vmatprep.mubr.msk.bf16.mxu1 %vm1158_vm0, %v1157_v0  ;;  %917 = vmatprep.subr.bf16.mxu0 %v1157_v0  ;;  %s1059_s21 = sshll.u32 %s1159_s20, 4  ;;  %s1060_s21 = int_to_ptr.vmem [resolvable:$false] %s1059_s21 }
  0x3e   : > { %s1429_s27 = smov (!%p352_p11, %s351_s27), 1 }
  0x3f   : > { %s874_s28 = sshll.u32 %s1429_s27, 3 }
  0x40   : > { %s356_s10 = scalar_lea.vmem %s1411_s1, %s874_s28  ;;  %918 = vmatpush3.bf16.msra.mxu0 %v1011_v6  ;;  %s712_s28 = sshll.u32 %s344_s25, 4  ;;  %s1332_s28 = int_to_ptr.vmem [resolvable:$true] %s712_s28 }
  0x41   : > { %919 = vmatprep.subr.bf16.mxu0 %v1157_v0  ;;  %v1008_v14 = vld [vmem:[%s356_s10] sm:$0xff]   ;;  %s1055_s18 = scalar_lea.vmem %s1332_s28, 128  ;;  %p1062_p3 = scmp.lt.s32.totalorder %s1332_s28, %s1060_s21 }
  0x42   : > { %p1056_p0 = scmp.ne.s32.totalorder %s1332_s28, %s1055_s18 }
  0x44   : > { %920 = vmatpush3.bf16.msra.mxu0 %v1012_v7  ;;  %p1057_p1 = pnand %p1056_p0, %p1254_p10 }
  0x45   : > { %921 = vmatprep.subr.bf16.mxu0 %v1157_v0 }
  0x46   : > { %p1058_p2 = pneg %p1057_p1 }
  0x48   : > { %922 = vmatpush3.bf16.msra.mxu0 %v1013_v8 }
  0x49   : > { %923 = vmatprep.subr.bf16.mxu0 %v1157_v0 }
  0x4c   : > { %924 = vmatpush3.bf16.msra.mxu0 %v1014_v15 }
  0x4d   : > { %925 = vmatprep.subr.bf16.mxu0 %v1157_v0 }
  0x50   : > { %926 = vmatpush3.bf16.msra.mxu0 %v1015_v16 }
  0x51   : > { %927 = vmatprep.subr.bf16.mxu0 %v1157_v0 }
  0x54   : > { %928 = vmatpush3.bf16.msra.mxu0 %v1016_v17 }
  0xfc   : > { %v416_v9 = vpop.f32.mrf.mxu1 }
  0xfe   : > { %v905_v10 = vpop.f32.mrf.mxu1 }
 0x100   : > { %v419_v11 = vpop.f32.mrf.mxu1 }
 0x101   : > { %v423_v12 = vpack.c.bf16 %v419_v11, %v416_v9 }
 0x102   : > { %v906_v13 = vpop.f32.mrf.mxu1 }
 0x103   : > { %908 = vmatpush3.bf16.msra.mxu1 %v423_v12 }
 0x104   : > { %933 = vmatprep.subr.bf16.mxu1 %v1157_v0 }
 0x106   : > { %910 = vmatmul.mubr.msk.bf16.vlgmr.msra.gmra.mxu1 %vm436_vm3, %v1008_v14 }
 0x107   : > { %935 = vmatprep.mubr.msk.bf16.mxu1 %vm1158_vm0, %v1157_v0 }
 0x1c6   : > { %v474_v19 = vpop.f32.mrf.mxu1 }
 0x1c7   : > { %v475_v21 = vadd.f32 %v852_v18, %v474_v19 }
 0x1c8   : > { %v911_v20 = vpop.f32.mrf.mxu1 }
 0x1c9   : > { %v481_v25 = vmax.f32 %v475_v21, 0.0 }
 0x1ca   : > { %v477_v22 = vpop.f32.mrf.mxu1 }
 0x1cb   : > { %v478_v23 = vadd.f32 %v852_v18, %v477_v22 }
 0x1cc   : > { %v912_v24 = vpop.f32.mrf.mxu1 }
 0x1cd   : > { %v482_v26 = vmax.f32 %v478_v23, 0.0 }
 0x1cf   : > { %v483_v27 = vpack.c.bf16 %v482_v26, %v481_v25 }
 0x1d1   : > { %930 = vmatmul.mubr.bf16.vlgmr.msra.gmra.mxu0 %v483_v27 }
 0x291   : > { %v582_v28 = vpop.f32.mrf.mxu0 }
 0x293   : > { %v931_v29 = vpop.f32.mrf.mxu0 }
 0x295   : > { %v585_v30 = vpop.f32.mrf.mxu0 }
 0x296   : > { %v589_v31 = vpack.c.bf16 %v585_v30, %v582_v28 }
 0x297   : > { %v932_v32 = vpop.f32.mrf.mxu0 }
 0x298   : > { %934 = vmatpush3.bf16.msra.mxu1 %v589_v31 }
 0x299   : > { %939 = vmatprep.subr.bf16.mxu1 %v1157_v0 }
 0x29b   : > { %936 = vmatmul.mubr.msk.bf16.vlgmr.msra.gmra.mxu1 %vm436_vm3, %v1008_v14 }
 0x29c   : > { %941 = vmatprep.mubr.msk.bf16.mxu1 %vm1158_vm0, %v1157_v0 }
 0x35b   : > { %v631_v33 = vpop.f32.mrf.mxu1 }
 0x35c   : > { %v632_v37 = vadd.f32 %v863_v34, %v631_v33 }
 0x35d   : > { %v937_v35 = vpop.f32.mrf.mxu1 }
 0x35f   : > { %v634_v36 = vpop.f32.mrf.mxu1 }
 0x360   : > { %v635_v38 = vadd.f32 %v863_v34, %v634_v36 }
 0x361   : > { %v938_v39 = vpop.f32.mrf.mxu1 }
 0x362   : > { %v639_v40 = vpack.c.bf16 %v635_v38, %v632_v37 }
 0x364   : > { %883 = vst [vmem:[%s344_s25] sm:$0xff] %v639_v40   ;;  %940 = vmatpush3.bf16.msra.mxu1 %v639_v40  ;;  %s1061_s25 = scalar_lea.vmem %s1060_s21, 256 }
 0x365   : > { %p1063_p4 = scmp.lt.s32.totalorder %s1061_s25, %s1055_s18 }
 0x367   : > { %942 = vmatmul.mubr.msk.bf16.vlgmr.msra.gmra.mxu1 %vm436_vm3, %v638_v41  ;;  %p1064_p5 = por %p1063_p4, %p1062_p3 }
 0x369   : > { %p1065_p6 = pnand %p1064_p5, %p1058_p2 }
 0x36b   : > { %1068 = shalt.err (!%p1065_p6)
}
 0x36c   : > { %s1069_s26 = scalar_lea.hbm %s1338_s11, 128  ;;  %s1073_s30 = scalar_lea.hbm %s1418_s8, 384 }
 0x36d   : > { %p1070_p7 = scmp.ne.s32.totalorder %s1338_s11, %s1069_s26  ;;  %p1074_p12 = scmp.lt.s32.totalorder %s1338_s11, %s1418_s8 }
 0x36e   : > { %p1075_p13 = scmp.lt.s32.totalorder %s1073_s30, %s1069_s26 }
 0x36f   : > { %p1071_p8 = pnand %p1070_p7, %p1254_p10 }
 0x370   : > { %p1076_p11 = por %p1075_p13, %p1074_p12 }
 0x371   : > { %p1072_p9 = pneg %p1071_p8 }
 0x373   : > { %p1077_p0 = pnand %p1076_p11, %p1072_p9 }
 0x375   : > { %1080 = shalt.err (!%p1077_p0)
}
 0x376   : > { %s1160_s18 = smov 64   ;;  %s1161_s21 = smov 4  }
 0x377   : > { %949 = dma.vmem_to_hbm [thread:$0]  (%p1254_p10), %s1332_s28, 128, %s1338_s11, %s695_s12, %s1160_s18, %s1160_s18, %s1161_s21  }
 0x378   : > { %s871_s25 = sshll.u32 %s1237_s17, 4  ;;  %s350_s27 = scalar_lea.vmem [#allocation8], %s1322_s13 }
 0x379   : > { %s728_s29 = sshll.u32 %s350_s27, 4  ;;  %s1368_s10 = scalar_lea.hbm %s1419_s9, %s871_s25  ;;  %s1370_s29 = int_to_ptr.vmem [resolvable:$true] %s728_s29 }
 0x37a   : > { %s700_s20 = scalar_lea.sflag [#allocation9], %s1322_s13  ;;  %s1081_s28 = scalar_lea.vmem %s1370_s29, 16 }
 0x37b   : > { %p1082_p1 = scmp.ne.s32.totalorder %s1370_s29, %s1081_s28  ;;  %s1162_s17 = smov [#allocation8]  }
 0x37c   : > { %s1085_s11 = sshll.u32 %s1162_s17, 4  ;;  %s1086_s11 = int_to_ptr.vmem [resolvable:$false] %s1085_s11 }
 0x37d   : > { %p1083_p2 = pnand %p1082_p1, %p1254_p10  ;;  %s1087_s12 = scalar_lea.vmem %s1086_s11, 32 }
 0x37e   : > { %p1088_p4 = scmp.lt.s32.totalorder %s1370_s29, %s1086_s11  ;;  %p1089_p5 = scmp.lt.s32.totalorder %s1087_s12, %s1081_s28 }
 0x37f   : > { %p1084_p3 = pneg %p1083_p2 }
 0x380   : > { %p1090_p6 = por %p1089_p5, %p1088_p4 }
 0x382   : > { %p1091_p7 = pnand %p1090_p6, %p1084_p3 }
 0x427   : > { %v677_v42 = vpop.f32.mrf.mxu1 }
 0x428   : > { %v692_v43 = vpack.c.bf16 %v677_v42, %v677_v42 }
 0x429   : > { %v943_v44 = vpop.f32.mrf.mxu1 }
 0x42a   : > { %693 = vst [vmem:[%s350_s27] sm:$0x1] %v692_v43 }
 0x42b   : > { %v680_v45 = vpop.f32.mrf.mxu1 }
 0x42c   : > { %1094 = shalt.err (!%p1091_p7)
}
 0x42d   : > { %s1095_s18 = scalar_lea.hbm %s1368_s10, 16  ;;  %s1099_s25 = scalar_lea.hbm %s1419_s9, 48 }
 0x42e   : > { %p1096_p8 = scmp.ne.s32.totalorder %s1368_s10, %s1095_s18  ;;  %p1100_p13 = scmp.lt.s32.totalorder %s1368_s10, %s1419_s9 }
 0x42f   : > { %p1101_p11 = scmp.lt.s32.totalorder %s1099_s25, %s1095_s18 }
 0x430   : > { %p1097_p9 = pnand %p1096_p8, %p1254_p10 }
 0x431   : > { %p1102_p0 = por %p1101_p11, %p1100_p13 }
 0x432   : > { %p1098_p12 = pneg %p1097_p9 }
 0x434   : > { %p1103_p1 = pnand %p1102_p0, %p1098_p12 }
 0x436   : > { %1106 = shalt.err (!%p1103_p1)
}
 0x437   : > { %950 = dma.vmem_to_hbm [thread:$0]  (%p1254_p10), %s1370_s29, 16, %s1368_s10, %s700_s20   ;;  %v944_v46 = vpop.f32.mrf.mxu1 }
 0x438 PF: > { %p966_p2 = scmp.ge.s32.totalorder %s1151_s16, 2  ;;  %s740_s30 = sand.u32 1, %s1139_s14  }
 0x439   : > { %p1423_p3 = scmp.ne.s32.totalorder %s1421_s24, 0  ;;  %s741_s28 = scalar_lea.sflag [#allocation6], %s740_s30 }
 0x43b   : > { %p958_p4 = pnand %p966_p2, %p1423_p3 }
 0x43d   : > { %p959_p5 = pneg %p958_p4 }
 0x43f   : > { %1130 = dma.done.wait (%p959_p5), %s741_s28, 128  }
 0x440   : > { %1132 = vsyncadd (%p959_p5), %s741_s28, 4294967168  ;;  %s750_s17 = scalar_lea.sflag [#allocation9], %s740_s30 }
 0x441   : > { %1134 = dma.done.wait (%p959_p5), %s750_s17, 16  }
 0x442   : > { %1136 = vsyncadd (%p959_p5), %s750_s17, 4294967280  ;;  %p30_p10 = scmp.ge.s32.totalorder %s1241_s19, 5   ;;  %s1424_s14 = smov %s1143_s0 }
 0x443   : > { %s1425_s0 = smov %s1147_s15  ;;  %s1426_s15 = smov %s1252_s22 }
 0x444   : > { %s1427_s16 = smov %s1241_s19  ;;  %32 = sbr.rel (!%p30_p10) target bundleno = 21 (0x15), region = 108 }
 0x449   :  { %754 = vsyncpa [#allocation5], 1 }
 0x44a   :  { %756 = vsyncpa [#allocation5 + $0x1], 1 }
 0x44b   :  { %757 = vsyncpa [#allocation6], 1 }
 0x44c   :  { %759 = vsyncpa [#allocation6 + $0x1], 1 }
 0x44d   :  { %760 = vsyncpa [#allocation9], 1 }
 0x44e   :  { %762 = vsyncpa [#allocation9 + $0x1], 1 }

</bundles_post_ra>
